<compile_context>
chip_gen: v5e
topology: v5e:2x2
jax: 0.10.0
libtpu: 0.0.40
codegen_flags: <defaults>
</compile_context>

<pallas_src>
import functools

import jax
import jax.numpy as jnp
from jax import lax
from jax.experimental import pallas as pl
from jax.experimental.pallas import tpu as pltpu

LANES = 128
ACC_ROWS = 8               # one f32 vreg worth of sublanes for the partial sum
DEFAULT_CHUNK_ROWS = 512   # in-kernel compute chunk (bounds vreg/VMEM pressure)


def _tpu_params():
    """Best-effort (vmem_capacity_bytes, num_tensorcores, device_kind)."""
    vmem_cap = 64 * 1024 * 1024    # conservative fallback (v7x-sized)
    num_cores = 1
    kind = ""
    try:
        kind = jax.devices()[0].device_kind.lower()
    except Exception:
        pass
    try:
        info = pltpu.get_tpu_info()
        vmem_cap = int(getattr(info, "vmem_capacity_bytes", vmem_cap))
        for attr in ("num_cores", "core_count", "num_tensorcores",
                     "tensorcores_per_chip"):
            v = getattr(info, attr, None)
            if v:
                num_cores = max(1, int(v))
                break
    except Exception:
        pass
    # Dual-TensorCore chips expose 2 TCs per JAX device.
    if num_cores == 1 and any(s in kind for s in ("v7", "v5p", "v4")):
        num_cores = 2
    return vmem_cap, num_cores, kind


def _focal_elementwise(x, t, *, alpha, gamma, logits):
    """Per-element focal loss in f32 (inputs upcast in-kernel)."""
    if x.dtype != jnp.float32:
        x = x.astype(jnp.float32)
    if t.dtype != jnp.float32:
        t = t.astype(jnp.float32)
    if logits:
        # Numerically stable BCE-with-logits: max(x,0) - x*t + log1p(exp(-|x|))
        bce = jnp.maximum(x, 0.0) - x * t + jnp.log1p(jnp.exp(-jnp.abs(x)))
    else:
        # PyTorch binary_cross_entropy clamps log terms at -100.
        log_p = jnp.maximum(jnp.log(x), -100.0)
        log_1mp = jnp.maximum(jnp.log(1.0 - x), -100.0)
        bce = -(t * log_p + (1.0 - t) * log_1mp)
    pt = jnp.exp(-bce)
    om_pt = 1.0 - pt
    if gamma == 2.0:             # default: multiply instead of pow
        w = om_pt * om_pt
    elif gamma == 1.0:
        w = om_pt
    elif gamma == 0.0:
        w = None
    else:
        w = om_pt ** gamma
    fl = bce if w is None else w * bce
    if alpha != 1.0:
        fl = alpha * fl
    return fl


def _for_each_chunk(tile_rows, chunk_rows, emit):
    """Call emit(row_start, row_count) covering [0, tile_rows) in chunks."""
    n_full = tile_rows // chunk_rows
    rem = tile_rows - n_full * chunk_rows
    if n_full == 1:
        emit(0, chunk_rows)
    elif n_full > 1:
        def body(k, carry):
            emit(pl.multiple_of(k * chunk_rows, 8), chunk_rows)
            return carry
        lax.fori_loop(0, n_full, body, 0, unroll=True)
    if rem:
        emit(n_full * chunk_rows, rem)


def _accumulate_chunk(out_ref, fl):
    """Fold an (r, 128) f32 chunk onto the (8, 128) accumulator (VPU adds only)."""
    r = fl.shape[0]
    r8 = (r // ACC_ROWS) * ACC_ROWS
    if r8:
        out_ref[...] += jnp.sum(fl[:r8].reshape(-1, ACC_ROWS, LANES), axis=0)
    if r8 < r:
        out_ref[pl.ds(0, r - r8), :] += fl[r8:r, :]


def _focal_sum_kernel(x_ref, t_ref, out_ref, *, steps_per_part, total_tiles,
                      tile_rows, chunk_rows, tail_valid_rows,
                      alpha, gamma, logits):
    """reduce=True kernel: per-part partial sums into the (8,128) output block."""
    c = pl.program_id(0)
    i = pl.program_id(1)
    tile_idx = c * steps_per_part + i

    @pl.when(i == 0)
    def _():
        out_ref[...] = jnp.zeros_like(out_ref)

    def accumulate(valid_rows):
        def emit(r0, size):
            xb = x_ref[pl.ds(r0, size), :]
            tb = t_ref[pl.ds(r0, size), :]
            fl = _focal_elementwise(xb, tb, alpha=alpha, gamma=gamma,
                                    logits=logits)
            if valid_rows is not None:
                # Zero contributions from the out-of-bounds (garbage) rows of
                # the ragged tail tile; select, so NaN/Inf never propagates.
                rid = lax.broadcasted_iota(jnp.int32, (size, 1), 0) + r0
                fl = jnp.where(rid < valid_rows, fl, 0.0)
            _accumulate_chunk(out_ref, fl)
        _for_each_chunk(tile_rows, chunk_rows, emit)

    if tail_valid_rows is None:
        accumulate(None)
    else:
        last = total_tiles - 1

        @pl.when(tile_idx != last)
        def _():
            accumulate(None)          # full tiles: no masking cost

        @pl.when(tile_idx == last)
        def _():
            accumulate(tail_valid_rows)


def _focal_map_kernel(x_ref, t_ref, o_ref, *, tile_rows, chunk_rows,
                      alpha, gamma, logits):
    """reduce=False kernel: elementwise focal loss (OOB output rows dropped)."""
    def emit(r0, size):
        xb = x_ref[pl.ds(r0, size), :]
        tb = t_ref[pl.ds(r0, size), :]
        fl = _focal_elementwise(xb, tb, alpha=alpha, gamma=gamma, logits=logits)
        o_ref[pl.ds(r0, size), :] = fl.astype(o_ref.dtype)
    _for_each_chunk(tile_rows, chunk_rows, emit)


def focal_loss(inputs, targets, alpha=1.0, gamma=2.0, logits=False, reduce=True,
               *, _max_tile_rows=None, _chunk_rows=None):
    """Pallas TPU implementation of FocalLoss.forward (defaults match the module)."""
    orig_shape = inputs.shape
    n = int(inputs.size)
    alpha = float(alpha)
    gamma = float(gamma)
    logits = bool(logits)

    # Pad values for the (rare) n % 128 != 0 fallback; chosen so padded
    # elements contribute ~exactly zero focal loss (bce ~ 0 -> pt ~ 1).
    pad_x, pad_t = (100.0, 1.0) if logits else (1.0, 1.0)

    x = inputs.reshape(-1)
    t = targets.reshape(-1)

    # Only pad up to the lane width (128): the common NCHW case (n % 128 == 0)
    # needs NO extra HBM pass; ragged row tiles are handled in-kernel.
    lane_pad = (-n) % LANES
    if lane_pad:
        x = jnp.pad(x, (0, lane_pad),
                    constant_values=jnp.dtype(x.dtype).type(pad_x))
        t = jnp.pad(t, (0, lane_pad),
                    constant_values=jnp.dtype(t.dtype).type(pad_t))
    rows = (n + lane_pad) // LANES
    x2 = x.reshape(rows, LANES)
    t2 = t.reshape(rows, LANES)

    vmem_cap, num_cores, kind = _tpu_params()
    max_tile_rows = 4096 if vmem_cap >= 96 * 1024 * 1024 else 2048
    if _max_tile_rows is not None:
        max_tile_rows = int(_max_tile_rows)
    vmem_limit = int(min(max(vmem_cap // 2, 16 * 1024 * 1024),
                         64 * 1024 * 1024))

    if rows <= max_tile_rows:
        # One block equal to the full array: no ragged rows, no masking needed.
        tile_rows = rows
        total_tiles = 1
        tail_valid_rows = None
    else:
        tile_rows = max_tile_rows            # multiple of 512 (and of 8/16/32)
        total_tiles = pl.cdiv(rows, tile_rows)
        rem = rows % tile_rows
        tail_valid_rows = rem if rem else None
    chunk_rows = min(int(_chunk_rows or DEFAULT_CHUNK_ROWS), tile_rows)

    in_bytes = x2.size * x2.dtype.itemsize + t2.size * t2.dtype.itemsize

    if not reduce:
        out_dtype = inputs.dtype
        kernel = functools.partial(_focal_map_kernel, tile_rows=tile_rows,
                                   chunk_rows=chunk_rows, alpha=alpha,
                                   gamma=gamma, logits=logits)
        tile_spec = pl.BlockSpec((tile_rows, LANES), lambda i: (i, 0))
        out2 = pl.pallas_call(
            kernel,
            out_shape=jax.ShapeDtypeStruct((rows, LANES), out_dtype),
            grid_spec=pltpu.PrefetchScalarGridSpec(
                num_scalar_prefetch=0,
                grid=(total_tiles,),
                in_specs=[tile_spec, tile_spec],
                out_specs=pl.BlockSpec((tile_rows, LANES), lambda i: (i, 0)),
            ),
            compiler_params=pltpu.CompilerParams(
                dimension_semantics=("parallel",),
                vmem_limit_bytes=vmem_limit),
            cost_estimate=pl.CostEstimate(
                flops=13 * n, transcendentals=3 * n,
                bytes_accessed=int(in_bytes + rows * LANES
                                   * jnp.dtype(out_dtype).itemsize)),
        )(x2, t2)
        out_flat = out2.reshape(-1)
        if lane_pad:
            out_flat = out_flat[:n]
        return out_flat.reshape(orig_shape)

    # ---- reduce=True: per-part (8,128) partial sums + tiny epilogue mean ----
    n_parts = 1
    if num_cores > 1 and total_tiles >= num_cores and total_tiles % num_cores == 0:
        n_parts = num_cores
    steps_per_part = total_tiles // n_parts

    if n_parts > 1:
        # v7x: explicit per-TensorCore split; v4/v5p megacore: "parallel" split.
        if "v7" in kind:
            dims = (pltpu.CORE_PARALLEL, pltpu.ARBITRARY)
        else:
            dims = ("parallel", "arbitrary")
    else:
        dims = ("arbitrary", "arbitrary")

    kernel = functools.partial(
        _focal_sum_kernel, steps_per_part=steps_per_part,
        total_tiles=total_tiles, tile_rows=tile_rows, chunk_rows=chunk_rows,
        tail_valid_rows=tail_valid_rows, alpha=alpha, gamma=gamma,
        logits=logits)

    in_spec = pl.BlockSpec((tile_rows, LANES),
                           lambda c, i: (c * steps_per_part + i, 0))
    out_spec = pl.BlockSpec((ACC_ROWS, LANES), lambda c, i: (c, 0))

    partials = pl.pallas_call(
        kernel,
        out_shape=jax.ShapeDtypeStruct((n_parts * ACC_ROWS, LANES), jnp.float32),
        grid_spec=pltpu.PrefetchScalarGridSpec(
            num_scalar_prefetch=0,
            grid=(n_parts, steps_per_part),
            in_specs=[in_spec, in_spec],
            out_specs=out_spec,
        ),
        compiler_params=pltpu.CompilerParams(
            dimension_semantics=dims,
            vmem_limit_bytes=vmem_limit),
        cost_estimate=pl.CostEstimate(
            flops=13 * n, transcendentals=3 * n,
            bytes_accessed=int(in_bytes + n_parts * ACC_ROWS * LANES * 4)),
    )(x2, t2)

    # Tiny epilogue reduction over (n_parts*8, 128) partials + the mean scale.
    return jnp.sum(partials) / jnp.float32(n)


def _reference_focal_loss(inputs, targets, alpha=1.0, gamma=2.0,
                          logits=False, reduce=True):
    x = inputs.astype(jnp.float32)
    t = targets.astype(jnp.float32)
    if logits:
        bce = jnp.maximum(x, 0.0) - x * t + jnp.log1p(jnp.exp(-jnp.abs(x)))
    else:
        bce = -(t * jnp.maximum(jnp.log(x), -100.0)
                + (1.0 - t) * jnp.maximum(jnp.log(1.0 - x), -100.0))
    pt = jnp.exp(-bce)
    fl = alpha * (1.0 - pt) ** gamma * bce
    return jnp.mean(fl) if reduce else fl


if __name__ == "__main__":
    key = jax.random.PRNGKey(0)
    k1, k2 = jax.random.split(key)

    # Module-consistent shapes: predictions/targets of shape (2, 4, 16, 16).
    B, C, H, W = 2, 4, 16, 16
    probs = jax.nn.sigmoid(jax.random.normal(k1, (B, C, H, W), jnp.float32))
    targets = jax.random.bernoulli(k2, 0.5, (B, C, H, W)).astype(jnp.float32)

    # Default path: probabilities, reduce=True.
    loss = jax.block_until_ready(focal_loss(probs, targets))
    ref = _reference_focal_loss(probs, targets)
    assert jnp.allclose(loss, ref, rtol=1e-5, atol=1e-6), (loss, ref)

    # Unreduced path.
    fl_map = jax.block_until_ready(focal_loss(probs, targets, reduce=False))
    ref_map = _reference_focal_loss(probs, targets, reduce=False)
    assert jnp.allclose(fl_map, ref_map, rtol=1e-5, atol=1e-6)

    # Logits path.
    raw = jax.random.normal(k1, (B, C, H, W), jnp.float32)
    loss_l = jax.block_until_ready(focal_loss(raw, targets, logits=True))
    ref_l = _reference_focal_loss(raw, targets, logits=True)
    assert jnp.allclose(loss_l, ref_l, rtol=1e-5, atol=1e-6), (loss_l, ref_l)

    # Unaligned shape (1155 elements): exercises the lane-pad fallback and the
    # non-multiple-of-8 row count / remainder-chunk accumulation.
    shp = (3, 5, 7, 11)
    p_odd = jax.nn.sigmoid(jax.random.normal(k1, shp, jnp.float32))
    t_odd = jax.random.bernoulli(k2, 0.5, shp).astype(jnp.float32)
    l_odd = jax.block_until_ready(focal_loss(p_odd, t_odd))
    r_odd = _reference_focal_loss(p_odd, t_odd)
    assert jnp.allclose(l_odd, r_odd, rtol=1e-5, atol=1e-6), (l_odd, r_odd)
    f_odd = jax.block_until_ready(focal_loss(p_odd, t_odd, reduce=False))
    assert jnp.allclose(f_odd, _reference_focal_loss(p_odd, t_odd, reduce=False),
                        rtol=1e-5, atol=1e-6)

    # Small forced multi-tile config: exercises the ragged-tail row mask,
    # the pl.when tile split and the chunked fori_loop accumulation.
    shp3 = (3, 3, 32, 32)     # 9216 elements = 72 rows
    p3 = jax.nn.sigmoid(jax.random.normal(k1, shp3, jnp.float32))
    t3 = jax.random.bernoulli(k2, 0.5, shp3).astype(jnp.float32)
    r3 = _reference_focal_loss(p3, t3)
    l3 = jax.block_until_ready(
        focal_loss(p3, t3, _max_tile_rows=32, _chunk_rows=16))
    assert jnp.allclose(l3, r3, rtol=1e-5, atol=1e-6), (l3, r3)

    print("KERNEL_OK")
</pallas_src>

<mosaic_0001>
module attributes {stable_mosaic.version = 11 : i64} {
  func.func @_focal_sum_kernel(%arg0: i32, %arg1: i32, %arg2: memref<16x128xf32, #tpu.memory_space<vmem>>, %arg3: memref<16x128xf32, #tpu.memory_space<vmem>>, %arg4: memref<8x128xf32, #tpu.memory_space<vmem>>) attributes {dimension_semantics = [#tpu.dimension_semantics<arbitrary>, #tpu.dimension_semantics<arbitrary>], iteration_bounds = array<i64: 1, 1>, scalar_prefetch = 0 : i64, scratch_operands = 0 : i64, tpu.core_type = #tpu.core_type<tc>, window_params = [{transform_indices = @transform_0, window_bounds = array<i64: 16, 128>}, {transform_indices = @transform_1, window_bounds = array<i64: 16, 128>}, {transform_indices = @transform_2, window_bounds = array<i64: 8, 128>}]} {
    %c0_i32 = arith.constant 0 : i32
    %0 = arith.cmpi eq, %arg1, %c0_i32 : i32
    %1 = arith.extui %0 : i1 to i32
    %c0_i32_0 = arith.constant 0 : i32
    %2 = arith.cmpi ne, %1, %c0_i32_0 : i32
    scf.if %2 {
      %cst_15 = arith.constant 0.000000e+00 : f32
      %32 = vector.broadcast %cst_15 : f32 to vector<8x128xf32>
      %c0_16 = arith.constant 0 : index
      %c0_17 = arith.constant 0 : index
      %33 = vector.load %arg4[%c0_16, %c0_17] : memref<8x128xf32, #tpu.memory_space<vmem>>, vector<8x128xf32>
      tpu.vector_store %arg4[%c0_16, %c0_17], %32 {strides = array<i32>} : memref<8x128xf32, #tpu.memory_space<vmem>>, vector<8x128xf32>,
    } else {
    }
    %c0 = arith.constant 0 : index
    %c0_1 = arith.constant 0 : index
    %3 = vector.load %arg2[%c0, %c0_1] : memref<16x128xf32, #tpu.memory_space<vmem>>, vector<16x128xf32>
    %c0_2 = arith.constant 0 : index
    %c0_3 = arith.constant 0 : index
    %4 = vector.load %arg3[%c0_2, %c0_3] : memref<16x128xf32, #tpu.memory_space<vmem>>, vector<16x128xf32>
    %5 = math.log %3 : vector<16x128xf32>
    %cst = arith.constant -1.000000e+02 : f32
    %6 = vector.broadcast %cst : f32 to vector<16x128xf32>
    %7 = arith.maximumf %5, %6 : vector<16x128xf32>
    %cst_4 = arith.constant 1.000000e+00 : f32
    %8 = vector.broadcast %cst_4 : f32 to vector<16x128xf32>
    %9 = arith.subf %8, %3 : vector<16x128xf32>
    %10 = math.log %9 : vector<16x128xf32>
    %cst_5 = arith.constant -1.000000e+02 : f32
    %11 = vector.broadcast %cst_5 : f32 to vector<16x128xf32>
    %12 = arith.maximumf %10, %11 : vector<16x128xf32>
    %13 = arith.mulf %4, %7 : vector<16x128xf32>
    %cst_6 = arith.constant 1.000000e+00 : f32
    %14 = vector.broadcast %cst_6 : f32 to vector<16x128xf32>
    %15 = arith.subf %14, %4 : vector<16x128xf32>
    %16 = arith.mulf %15, %12 : vector<16x128xf32>
    %17 = arith.addf %13, %16 : vector<16x128xf32>
    %cst_7 = arith.constant 0.000000e+00 : f32
    %18 = vector.broadcast %cst_7 : f32 to vector<16x128xf32>
    %19 = arith.subf %18, %17 : vector<16x128xf32>
    %cst_8 = arith.constant 0.000000e+00 : f32
    %20 = vector.broadcast %cst_8 : f32 to vector<16x128xf32>
    %21 = arith.subf %20, %19 : vector<16x128xf32>
    %22 = math.exp %21 : vector<16x128xf32>
    %cst_9 = arith.constant 1.000000e+00 : f32
    %23 = vector.broadcast %cst_9 : f32 to vector<16x128xf32>
    %24 = arith.subf %23, %22 : vector<16x128xf32>
    %25 = arith.mulf %24, %24 : vector<16x128xf32>
    %26 = arith.mulf %25, %19 : vector<16x128xf32>
    %c0_10 = arith.constant 0 : index
    %c0_11 = arith.constant 0 : index
    %27 = vector.load %arg4[%c0_10, %c0_11] : memref<8x128xf32, #tpu.memory_space<vmem>>, vector<8x128xf32>
    %28 = vector.shape_cast %26 : vector<16x128xf32> to vector<2x8x128xf32>
    %cst_12 = arith.constant dense<0.000000e+00> : vector<8x128xf32>
    %29 = vector.multi_reduction <add>, %28, %cst_12 [0] : vector<2x8x128xf32> to vector<8x128xf32>
    %30 = arith.addf %27, %29 : vector<8x128xf32>
    %c0_13 = arith.constant 0 : index
    %c0_14 = arith.constant 0 : index
    %31 = vector.load %arg4[%c0_13, %c0_14] : memref<8x128xf32, #tpu.memory_space<vmem>>, vector<8x128xf32>
    tpu.vector_store %arg4[%c0_13, %c0_14], %30 {strides = array<i32>} : memref<8x128xf32, #tpu.memory_space<vmem>>, vector<8x128xf32>,
    return
  }
  func.func @transform_0(%arg0: i32, %arg1: i32) -> (i32, i32) {
    %c1_i32 = arith.constant 1 : i32
    %0 = arith.muli %arg0, %c1_i32 : i32
    %1 = arith.addi %0, %arg1 : i32
    %c0_i32 = arith.constant 0 : i32
    %c0_i32_0 = arith.constant 0 : i32
    return %1, %c0_i32 : i32, i32
  }
  func.func @transform_1(%arg0: i32, %arg1: i32) -> (i32, i32) {
    %c1_i32 = arith.constant 1 : i32
    %0 = arith.muli %arg0, %c1_i32 : i32
    %1 = arith.addi %0, %arg1 : i32
    %c0_i32 = arith.constant 0 : i32
    %c0_i32_0 = arith.constant 0 : i32
    return %1, %c0_i32 : i32, i32
  }
  func.func @transform_2(%arg0: i32, %arg1: i32) -> (i32, i32) {
    %c0_i32 = arith.constant 0 : i32
    %c0_i32_0 = arith.constant 0 : i32
    return %arg0, %c0_i32 : i32, i32
  }
}

</mosaic_0001>

<bundles_post_ra>
// kernel: tpu_custom_call.1
= control target key start
LH: loop header
LB: loop body
LE: loop exit
PB: predicated region body
PF: predicated region fallthrough
CT: control target
= control target key end

     0   :  { %7 = vsyncpa [#allocation3], 0  ;;  %s248_s0 = inlined_call_operand.hbm [shape: f32[16,128], index: 0, kind: input, shape index: {}]   ;;  %s249_s1 = inlined_call_operand.hbm [shape: f32[16,128], index: 1, kind: input, shape index: {}]   ;;  %s250_s2 = inlined_call_operand.hbm [shape: f32[8,128], index: 2, kind: output, shape index: {}]  }
   0x1   :  { %8 = vsyncpa [#allocation6], 0 }
   0x2   :  { %9 = vsyncpa [#allocation4], 0  ;;  %s18_s11 = sshll.u32 %s248_s0, 4  ;;  %s219_s12 = smov [#allocation2]   ;;  %s19_s11 = int_to_ptr.hbm [resolvable:$true] %s18_s11 }
   0x3   :  { %s20_s13 = sshll.u32 %s219_s12, 4  ;;  %s35_s16 = sshll.u32 %s249_s1, 4  ;;  %s21_s13 = int_to_ptr.vmem [resolvable:$true] %s20_s13  ;;  %s36_s16 = int_to_ptr.hbm [resolvable:$true] %s35_s16 }
   0x4   :  { %s220_s17 = smov 128   ;;  %s221_s18 = smov 8  }
   0x5   :  { %26 = dma.hbm_to_vmem [thread:$0]  %s19_s11, 256, %s21_s13, [#allocation3], %s220_s17, %s220_s17, %s221_s18  }
   0x6   :  { %s222_s19 = smov [#allocation5]  }
   0x7   :  { %s37_s20 = sshll.u32 %s222_s19, 4  ;;  %s38_s20 = int_to_ptr.vmem [resolvable:$true] %s37_s20 }
   0x8   :  { %43 = dma.hbm_to_vmem [thread:$0]  %s36_s16, 256, %s38_s20, [#allocation6], %s220_s17, %s220_s17, %s221_s18  }
   0x9   :  { %213 = dma.done.wait [#allocation3], 256  }
   0xa   :  { %214 = vsyncadd [#allocation3], 4294967040 }
   0xb   :  { %215 = dma.done.wait [#allocation6], 256  }
   0xc   :  { %216 = vsyncadd [#allocation6], 4294967040  ;;  %v61_v0 = vld [vmem:[#allocation2] sm:$0xff]  ;;  %v62_v1 = vld [vmem:[#allocation2 + $0x8] sm:$0xff]  ;;  %s223_s0 = smov [#allocation7]   ;;  %s112_s23 = sshll.u32 %s250_s2, 4  ;;  %s113_s23 = int_to_ptr.hbm [resolvable:$true] %s112_s23 }
   0xd   :  { %129 = vlog2.f32 %v61_v0  ;;  %v71_v2 = vsub.f32 1.0, %v61_v0  ;;  %v72_v3 = vsub.f32 1.0, %v62_v1  ;;  %v63_v5 = vld [vmem:[#allocation5] sm:$0xff]  ;;  %v64_v7 = vld [vmem:[#allocation5 + $0x8] sm:$0xff]  ;;  %s110_s1 = sshll.u32 %s223_s0, 4  ;;  %s111_s1 = int_to_ptr.vmem [resolvable:$true] %s110_s1 }
   0xe   :  { %131 = vlog2.f32 %v62_v1  ;;  %v81_v14 = vsub.f32 1.0, %v63_v5  ;;  %v82_v17 = vsub.f32 1.0, %v64_v7 }
   0xf   :  { %133 = vlog2.f32 %v71_v2 }
  0x10   :  { %135 = vlog2.f32 %v72_v3 }
  0x13   :  { %v130_v4 = vpop.eup %129 }
  0x14   :  { %v132_v6 = vpop.eup %131  ;;  %v66_v8 = vmul.f32 0.6931472, %v130_v4 }
  0x15   :  { %v134_v9 = vpop.eup %133  ;;  %v68_v10 = vmul.f32 0.6931472, %v132_v6 }
  0x16   :  { %v136_v11 = vpop.eup %135  ;;  %v69_v12 = vmax.f32 %v66_v8, -100.0  ;;  %v74_v13 = vmul.f32 0.6931472, %v134_v9 }
  0x17   :  { %v70_v15 = vmax.f32 %v68_v10, -100.0  ;;  %v76_v16 = vmul.f32 0.6931472, %v136_v11 }
  0x18   :  { %v77_v18 = vmax.f32 %v74_v13, -100.0  ;;  %v79_v19 = vmul.f32 %v69_v12, %v63_v5 }
  0x19   :  { %v78_v20 = vmax.f32 %v76_v16, -100.0  ;;  %v80_v21 = vmul.f32 %v70_v15, %v64_v7 }
  0x1a   :  { %v83_v22 = vmul.f32 %v81_v14, %v77_v18 }
  0x1b   :  { %v84_v23 = vmul.f32 %v82_v17, %v78_v20 }
  0x1c   :  { %v85_v24 = vadd.f32 %v83_v22, %v79_v19 }
  0x1d   :  { %v86_v25 = vadd.f32 %v84_v23, %v80_v21 }
  0x1e   :  { %v87_v26 = vsub.f32 0.0, %v85_v24 }
  0x1f   :  { %v88_v27 = vsub.f32 0.0, %v86_v25 }
  0x20   :  { %v89_v28 = vsub.f32 0.0, %v87_v26 }
  0x21   :  { %v90_v29 = vsub.f32 0.0, %v88_v27 }
  0x22   :  { %v91_v30 = vmul.f32 1.442695, %v89_v28 }
  0x23   :  { %v93_v31 = vmul.f32 1.442695, %v90_v29 }
  0x24   :  { %137 = vpow2.f32 %v91_v30 }
  0x25   :  { %139 = vpow2.f32 %v93_v31 }
  0x2a   :  { %v138_v32 = vpop.eup %137 }
  0x2b   :  { %v140_v33 = vpop.eup %139  ;;  %v95_v34 = vsub.f32 1.0, %v138_v32 }
  0x2c   :  { %v96_v35 = vsub.f32 1.0, %v140_v33 }
  0x2d   :  { %v97_v36 = vmul.f32 %v95_v34, %v95_v34 }
  0x2e   :  { %v98_v37 = vmul.f32 %v96_v35, %v96_v35 }
  0x2f   :  { %v99_v38 = vmul.f32 %v97_v36, %v87_v26 }
  0x30   :  { %v100_v39 = vmul.f32 %v98_v37, %v88_v27 }
  0x32   :  { %v102_v40 = vadd.f32 %v100_v39, %v99_v38 }
  0x34   :  { %104 = vst [vmem:[#allocation7] sm:$0xff] %v102_v40 }
  0x35   :  { %115 = dma.vmem_to_hbm [thread:$0]  %s111_s1, 128, %s113_s23, [#allocation4]  }
  0x36   :  { %217 = dma.done.wait [#allocation4], 128  }
  0x37   :  { %218 = vsyncadd [#allocation4], 4294967168 }
  0x38   :  { %120 = vsyncpa [#allocation3], 1 }
  0x39   :  { %121 = vsyncpa [#allocation6], 1 }
  0x3a   :  { %122 = vsyncpa [#allocation4], 1 }

</bundles_post_ra>
